<compile_context>
chip_gen: v5e
topology: v5e:2x2
jax: 0.10.0
libtpu: 0.0.40
codegen_flags: <defaults>
</compile_context>

<pallas_src>
import functools
import math

import jax
import jax.numpy as jnp
from jax.experimental import pallas as pl
from jax.experimental.pallas import tpu as pltpu

_INV_SQRT2 = 1.0 / math.sqrt(2.0)


def _round_up(x, m):
    return (x + m - 1) // m * m


def _vmem_limit(est_bytes):
    """Scoped-VMEM request: generous headroom, clamped per chip generation."""
    try:
        cap = int(pltpu.get_tpu_info().vmem_capacity_bytes)
    except Exception:
        cap = 64 << 20          # conservative (v7x physical VMEM)
    budget = cap - max(cap // 4, 16 << 20)   # leave room for Mosaic scratch
    want = int(1.5 * est_bytes) + (4 << 20)
    return int(min(max(want, 16 << 20), budget))


# --------------------------------------------------------------------------
# Shared in-kernel transform: dense -> exact gelu -> LayerNorm (all f32 math)
# --------------------------------------------------------------------------
def _transform(x, wd_ref, pack_ref, eps):
    # x: (tile_n, H) matmul dtype; wd_ref: (H, H); pack_ref: (3, H) f32
    h = jnp.dot(x, wd_ref[...], preferred_element_type=jnp.float32)
    pack = pack_ref[...]
    h = h + pack[0:1, :]                                      # dense bias
    h = h * 0.5 * (1.0 + jax.lax.erf(h * _INV_SQRT2))         # exact gelu
    mean = jnp.mean(h, axis=-1, keepdims=True)
    centered = h - mean
    var = jnp.mean(centered * centered, axis=-1, keepdims=True)
    h = centered * jax.lax.rsqrt(var + eps)
    return h * pack[1:2, :] + pack[2:3, :]                    # LN affine


# --------------------------------------------------------------------------
# Big-vocab head: token tiles x vocab tiles, h cached in VMEM scratch
# --------------------------------------------------------------------------
def _head_vtiled_kernel(x_ref, wd_ref, pack_ref, wdec_ref, bias_ref,
                        o_ref, h_ref, *, eps):
    # grid = (row tiles i [parallel], vocab tiles j [arbitrary, innermost])
    @pl.when(pl.program_id(1) == 0)
    def _():
        h = _transform(x_ref[...], wd_ref, pack_ref, eps)
        h_ref[...] = h.astype(h_ref.dtype)

    out = jnp.dot(h_ref[...], wdec_ref[...], preferred_element_type=jnp.float32)
    o_ref[...] = (out + bias_ref[...]).astype(o_ref.dtype)


def _fused_head_vtiled(x_p, hp, *, eps, tile_n, out_dtype, n_tokens):
    Np, H = x_p.shape
    Vp, tv, V = hp["vp"], hp["tile_v"], hp["v"]
    matmul_dtype = x_p.dtype
    isz = jnp.dtype(matmul_dtype).itemsize
    osz = jnp.dtype(out_dtype).itemsize

    vmem_est = (2 * tile_n * H * isz            # x tile (double buffered)
                + 2 * H * H * isz               # dense weight
                + 2 * 8 * H * 4                 # packed bd/gamma/beta
                + 2 * H * tv * isz              # decoder weight tile
                + 2 * 8 * tv * 4                # decoder bias tile
                + 2 * tile_n * tv * osz         # output tile
                + tile_n * H * isz)             # h scratch

    out = pl.pallas_call(
        functools.partial(_head_vtiled_kernel, eps=eps),
        out_shape=jax.ShapeDtypeStruct((Np, Vp), out_dtype),
        grid_spec=pltpu.PrefetchScalarGridSpec(
            num_scalar_prefetch=0,
            grid=(Np // tile_n, Vp // tv),
            in_specs=[
                pl.BlockSpec((tile_n, H), lambda i, j: (i, 0)),   # x tile
                pl.BlockSpec((H, H), lambda i, j: (0, 0)),        # dense W^T
                pl.BlockSpec((3, H), lambda i, j: (0, 0)),        # bd/gamma/beta
                pl.BlockSpec((H, tv), lambda i, j: (0, j)),       # decoder W^T tile
                pl.BlockSpec((1, tv), lambda i, j: (0, j)),       # decoder bias tile
            ],
            out_specs=pl.BlockSpec((tile_n, tv), lambda i, j: (i, j)),
            scratch_shapes=[pltpu.VMEM((tile_n, H), matmul_dtype)],
        ),
        compiler_params=pltpu.CompilerParams(
            dimension_semantics=("parallel", "arbitrary"),
            vmem_limit_bytes=_vmem_limit(vmem_est)),
    )(x_p, hp["wd_t"], hp["pack"], hp["wdec_t"], hp["bias"])

    return out[:n_tokens, :V]


# --------------------------------------------------------------------------
# Fused small-vocab heads: one pass over x, N heads computed per token tile
# --------------------------------------------------------------------------
def _small_heads_kernel(*refs, num_heads, eps):
    x_ref = refs[0]
    head_refs = refs[1:1 + 4 * num_heads]
    out_refs = refs[1 + 4 * num_heads:]

    x = x_ref[...]                              # load the token tile once
    for k in range(num_heads):
        wd_ref, pack_ref, wdec_ref, bias_ref = head_refs[4 * k:4 * k + 4]
        o_ref = out_refs[k]
        h = _transform(x, wd_ref, pack_ref, eps)
        out = jnp.dot(h.astype(wdec_ref.dtype), wdec_ref[...],
                      preferred_element_type=jnp.float32)
        o_ref[...] = (out + bias_ref[...]).astype(o_ref.dtype)


def _fused_small_heads(x_p, heads, *, eps, tile_n, out_dtype):
    Np, H = x_p.shape
    matmul_dtype = x_p.dtype
    isz = jnp.dtype(matmul_dtype).itemsize
    osz = jnp.dtype(out_dtype).itemsize
    num = len(heads)

    args = [x_p]
    in_specs = [pl.BlockSpec((tile_n, H), lambda i: (i, 0))]
    out_shapes, out_specs = [], []
    vmem_est = 2 * tile_n * H * isz
    for hp in heads:
        Vp = hp["vp"]
        args += [hp["wd_t"], hp["pack"], hp["wdec_t"], hp["bias"]]
        in_specs += [
            pl.BlockSpec((H, H), lambda i: (0, 0)),
            pl.BlockSpec((3, H), lambda i: (0, 0)),
            pl.BlockSpec((H, Vp), lambda i: (0, 0)),
            pl.BlockSpec((1, Vp), lambda i: (0, 0)),
        ]
        out_shapes.append(jax.ShapeDtypeStruct((Np, Vp), out_dtype))
        out_specs.append(pl.BlockSpec((tile_n, Vp), lambda i: (i, 0)))
        vmem_est += 2 * (H * H * isz + 8 * H * 4 + H * Vp * isz + 8 * Vp * 4
                         + tile_n * Vp * osz)

    outs = pl.pallas_call(
        functools.partial(_small_heads_kernel, num_heads=num, eps=eps),
        out_shape=tuple(out_shapes),
        grid_spec=pltpu.PrefetchScalarGridSpec(
            num_scalar_prefetch=0,
            grid=(Np // tile_n,),
            in_specs=in_specs,
            out_specs=out_specs,
        ),
        compiler_params=pltpu.CompilerParams(
            dimension_semantics=("parallel",),
            vmem_limit_bytes=_vmem_limit(vmem_est)),
    )(*args)

    if not isinstance(outs, (list, tuple)):
        outs = (outs,)
    return tuple(outs)


# --------------------------------------------------------------------------
# One-time parameter preparation (transpose / pad / cast / pack)
# --------------------------------------------------------------------------
def _prepare_head(p, *, matmul_dtype, tile_v):
    H = p["dense_weight"].shape[0]
    V = p["decoder_weight"].shape[0]
    tile_v_eff = min(tile_v, _round_up(V, 128))
    Vp = _round_up(V, tile_v_eff)

    wd_t = jnp.asarray(p["dense_weight"]).T.astype(matmul_dtype)      # (H, H)
    pack = jnp.stack([jnp.asarray(p["dense_bias"]),
                      jnp.asarray(p["ln_weight"]),
                      jnp.asarray(p["ln_bias"])], axis=0).astype(jnp.float32)

    wdec_t = jnp.asarray(p["decoder_weight"]).T                       # (H, V)
    bias = jnp.asarray(p["decoder_bias"]).astype(jnp.float32)
    if Vp != V:
        wdec_t = jnp.pad(wdec_t, ((0, 0), (0, Vp - V)))
        bias = jnp.pad(bias, (0, Vp - V))
    wdec_t = wdec_t.astype(matmul_dtype)                              # (H, Vp)
    bias = bias.reshape(1, Vp)

    return {"wd_t": wd_t, "pack": pack, "wdec_t": wdec_t, "bias": bias,
            "h": H, "v": V, "vp": Vp, "tile_v": tile_v_eff}


def prepare_params(params, *, matmul_dtype=jnp.bfloat16, tile_v=512):
    """Do the per-parameter transpose/pad/cast once, outside the hot path."""
    prepared = {"_prepared": True, "_matmul_dtype": matmul_dtype,
                "seq_relationship": params["seq_relationship"]}
    for name in ("lm", "pos_tag", "senti", "polarity"):
        p = params.get(name)
        prepared[name] = (None if p is None else
                          _prepare_head(p, matmul_dtype=matmul_dtype,
                                        tile_v=tile_v))
    return prepared


# --------------------------------------------------------------------------
# BertPreTrainingHeads forward
# --------------------------------------------------------------------------
def bert_pretraining_heads(sequence_output, pooled_output, params, *,
                           eps=1e-12, tile_n=256, tile_v=512,
                           matmul_dtype=jnp.bfloat16, out_dtype=None):
    """sequence_output: [B, S, H], pooled_output: [B, H].

    `params` is either the raw parameter dict ('lm' required; optional
    'pos_tag', 'senti', 'polarity'; plus 'seq_relationship') or the result of
    prepare_params() (preferred: weight prep is then done once, not per call).
    Returns (prediction_scores, seq_relationship_score,
             pos_tag_scores, senti_scores, polarity_scores).
    """
    B, S, H = sequence_output.shape
    N = B * S
    out_dtype = sequence_output.dtype if out_dtype is None else out_dtype

    prepared = (params if isinstance(params, dict) and params.get("_prepared")
                else prepare_params(params, matmul_dtype=matmul_dtype,
                                    tile_v=tile_v))
    mm_dtype = prepared["_matmul_dtype"]

    # Row-tile sizing: full 128-multiple tiles when there is enough work, and
    # at least 2 row tiles so v7x's two TensorCores can split the parallel axis.
    tile_n_eff = min(tile_n, _round_up(N, 16))
    if N > 128 and _round_up(N, tile_n_eff) // tile_n_eff < 2:
        tile_n_eff = _round_up((N + 1) // 2, 16)
    Np = _round_up(N, tile_n_eff)

    x2d = sequence_output.reshape(N, H)
    x_p = x2d if Np == N else jnp.pad(x2d, ((0, Np - N), (0, 0)))
    x_p = x_p.astype(mm_dtype)

    def run_vtiled(hp):
        y = _fused_head_vtiled(x_p, hp, eps=eps, tile_n=tile_n_eff,
                               out_dtype=out_dtype, n_tokens=N)
        return y.reshape(B, S, hp["v"])

    # LM head (real word vocab) always goes through the vocab-tiled kernel.
    prediction_scores = run_vtiled(prepared["lm"])

    # Small tag/senti/polarity heads: fuse every single-vocab-tile head into
    # one pallas_call (one HBM pass over x); anything bigger falls back to the
    # vocab-tiled kernel.
    results = {"pos_tag": None, "senti": None, "polarity": None}
    small_names = []
    for name in ("pos_tag", "senti", "polarity"):
        hp = prepared.get(name)
        if hp is None:
            continue
        if hp["vp"] == hp["tile_v"]:
            small_names.append(name)
        else:
            results[name] = run_vtiled(hp)
    if small_names:
        outs = _fused_small_heads(x_p, [prepared[n] for n in small_names],
                                  eps=eps, tile_n=tile_n_eff,
                                  out_dtype=out_dtype)
        for name, o in zip(small_names, outs):
            hp = prepared[name]
            results[name] = o[:N, :hp["v"]].reshape(B, S, hp["v"])

    # seq_relationship is a (B, H) x (H, 2) GEMM: cheaper to let XLA fuse it
    # than to pay a pallas_call launch + (8, 128) padding.
    sr = prepared["seq_relationship"]
    seq_relationship_score = (
        pooled_output.astype(jnp.float32) @ jnp.asarray(sr["weight"], jnp.float32).T
        + jnp.asarray(sr["bias"], jnp.float32)).astype(pooled_output.dtype)

    return (prediction_scores, seq_relationship_score,
            results["pos_tag"], results["senti"], results["polarity"])


# --------------------------------------------------------------------------
# Pure-JAX reference mirroring the PyTorch forward
# --------------------------------------------------------------------------
def _reference_heads(sequence_output, pooled_output, params, eps=1e-12):
    def head(x, p):
        h = x @ p["dense_weight"].T + p["dense_bias"]
        h = h * 0.5 * (1.0 + jax.lax.erf(h / jnp.sqrt(2.0)))
        mean = jnp.mean(h, axis=-1, keepdims=True)
        var = jnp.mean((h - mean) ** 2, axis=-1, keepdims=True)
        h = (h - mean) / jnp.sqrt(var + eps)
        h = h * p["ln_weight"] + p["ln_bias"]
        return h @ p["decoder_weight"].T + p["decoder_bias"]

    pred = head(sequence_output, params["lm"])
    pos = head(sequence_output, params["pos_tag"])
    senti = head(sequence_output, params["senti"])
    pol = head(sequence_output, params["polarity"])
    sr = params["seq_relationship"]
    seq_rel = pooled_output @ sr["weight"].T + sr["bias"]
    return pred, seq_rel, pos, senti, pol


def _make_head_params(key, H, V):
    k1, k2, k3, k4 = jax.random.split(key, 4)
    return {
        "dense_weight": 0.05 * jax.random.normal(k1, (H, H), dtype=jnp.float32),
        "dense_bias": 0.01 * jax.random.normal(k2, (H,), dtype=jnp.float32),
        "ln_weight": 1.0 + 0.05 * jax.random.normal(k3, (H,), dtype=jnp.float32),
        "ln_bias": 0.05 * jax.random.normal(k4, (H,), dtype=jnp.float32),
        # decoder weight is the tied embedding table [V, H]
        "decoder_weight": 0.05 * jax.random.normal(
            jax.random.fold_in(key, 7), (V, H), dtype=jnp.float32),
        # self.bias = nn.Parameter(torch.zeros(V))
        "decoder_bias": jnp.zeros((V,), dtype=jnp.float32),
    }


if __name__ == "__main__":
    # Small shapes consistent with the module: batch=2, seq=8, hidden=32,
    # word vocab=24, pos-tag vocab=5, senti vocab=16, polarity vocab=3.
    B, S, H = 2, 8, 32
    Vw, Vt, Vs, Vpol = 24, 5, 16, 3

    key = jax.random.PRNGKey(0)
    (k_seq, k_pool, k_lm, k_pos, k_senti, k_pol,
     k_srw, k_srb) = jax.random.split(key, 8)

    sequence_output = jax.random.normal(k_seq, (B, S, H), dtype=jnp.float32)
    pooled_output = jax.random.normal(k_pool, (B, H), dtype=jnp.float32)

    params = {
        "lm": _make_head_params(k_lm, H, Vw),
        "pos_tag": _make_head_params(k_pos, H, Vt),
        "senti": _make_head_params(k_senti, H, Vs),
        "polarity": _make_head_params(k_pol, H, Vpol),
        "seq_relationship": {
            "weight": 0.05 * jax.random.normal(k_srw, (2, H), dtype=jnp.float32),
            "bias": 0.01 * jax.random.normal(k_srb, (2,), dtype=jnp.float32),
        },
    }

    refs = _reference_heads(sequence_output, pooled_output, params)
    names = ["prediction", "seq_relationship", "pos_tag", "senti", "polarity"]
    expected_shapes = [(B, S, Vw), (B, 2), (B, S, Vt), (B, S, Vs), (B, S, Vpol)]

    def check(outs, atol, rtol, tag):
        for name, got, ref, shp in zip(names, outs, refs, expected_shapes):
            assert got.shape == shp, (tag, name, got.shape, shp)
            g = got.astype(jnp.float32)
            err = float(jnp.max(jnp.abs(g - ref)))
            assert jnp.allclose(g, ref, atol=atol, rtol=rtol), (tag, name, err)

    # Path 1: f32 matmul operands (prepared once) — matches PyTorch math to 1e-4.
    prep_f32 = prepare_params(params, matmul_dtype=jnp.float32)
    outs_f32 = bert_pretraining_heads(sequence_output, pooled_output, prep_f32)
    outs_f32 = jax.block_until_ready(outs_f32)
    check(outs_f32, atol=1e-4, rtol=1e-4, tag="f32")

    # Path 2: production default (bf16 matmul operands, f32 accumulation) —
    # tolerance gated on the operand dtype.
    outs_bf16 = bert_pretraining_heads(sequence_output, pooled_output, params)
    outs_bf16 = jax.block_until_ready(outs_bf16)
    check(outs_bf16, atol=3e-2, rtol=3e-2, tag="bf16")

    print("KERNEL_OK")
</pallas_src>

<mosaic_0001>
module attributes {stable_mosaic.version = 11 : i64} {
  func.func @_head_vtiled_kernel(%arg0: i32, %arg1: i32, %arg2: memref<16x32xf32, #tpu.memory_space<vmem>>, %arg3: memref<32x32xf32, #tpu.memory_space<vmem>>, %arg4: memref<3x32xf32, #tpu.memory_space<vmem>>, %arg5: memref<32x128xf32, #tpu.memory_space<vmem>>, %arg6: memref<1x128xf32, #tpu.memory_space<vmem>>, %arg7: memref<16x128xf32, #tpu.memory_space<vmem>>, %arg8: memref<16x32xf32, #tpu.memory_space<vmem>>) attributes {dimension_semantics = [#tpu.dimension_semantics<parallel>, #tpu.dimension_semantics<arbitrary>], iteration_bounds = array<i64: 1, 1>, scalar_prefetch = 0 : i64, scratch_operands = 1 : i64, tpu.core_type = #tpu.core_type<tc>, window_params = [{transform_indices = @transform_0, window_bounds = array<i64: 16, 32>}, {pipeline_mode = #tpu.pipeline_mode<synchronous>, transform_indices = @transform_1, window_bounds = array<i64: 32, 32>}, {pipeline_mode = #tpu.pipeline_mode<synchronous>, transform_indices = @transform_2, window_bounds = array<i64: 3, 32>}, {transform_indices = @transform_3, window_bounds = array<i64: 32, 128>}, {transform_indices = @transform_4, window_bounds = array<i64: 1, 128>}, {transform_indices = @transform_5, window_bounds = array<i64: 16, 128>}]} {
    %c0_i32 = arith.constant 0 : i32
    %0 = arith.cmpi eq, %arg1, %c0_i32 : i32
    %1 = arith.extui %0 : i1 to i32
    %c0_i32_0 = arith.constant 0 : i32
    %2 = arith.cmpi ne, %1, %c0_i32_0 : i32
    scf.if %2 {
      %c0_8 = arith.constant 0 : index
      %c0_9 = arith.constant 0 : index
      %10 = vector.load %arg2[%c0_8, %c0_9] : memref<16x32xf32, #tpu.memory_space<vmem>>, vector<16x32xf32>
      %c0_10 = arith.constant 0 : index
      %c0_11 = arith.constant 0 : index
      %11 = vector.load %arg3[%c0_10, %c0_11] : memref<32x32xf32, #tpu.memory_space<vmem>>, vector<32x32xf32>
      %cst_12 = arith.constant dense<0.000000e+00> : vector<16x32xf32>
      %12 = tpu.matmul %10, %11, %cst_12 {dimension_numbers = #tpu.dot_dimension_numbers<[1], [0], [0], [1], [0, 0, 1, 1], [], []>} : vector<16x32xf32>, vector<32x32xf32>, vector<16x32xf32> -> vector<16x32xf32>
      %c0_13 = arith.constant 0 : index
      %c0_14 = arith.constant 0 : index
      %13 = vector.load %arg4[%c0_13, %c0_14] : memref<3x32xf32, #tpu.memory_space<vmem>>, vector<3x32xf32>
      %14 = vector.extract_strided_slice %13 {offsets = [0, 0], sizes = [1, 32], strides = [1, 1]} : vector<3x32xf32> to vector<1x32xf32>
      %15 = vector.broadcast %14 : vector<1x32xf32> to vector<16x32xf32>
      %16 = arith.addf %12, %15 : vector<16x32xf32>
      %cst_15 = arith.constant 5.000000e-01 : f32
      %17 = vector.broadcast %cst_15 : f32 to vector<16x32xf32>
      %18 = arith.mulf %16, %17 : vector<16x32xf32>
      %cst_16 = arith.constant 0.707106769 : f32
      %19 = vector.broadcast %cst_16 : f32 to vector<16x32xf32>
      %20 = arith.mulf %16, %19 : vector<16x32xf32>
      %21 = math.erf %20 : vector<16x32xf32>
      %cst_17 = arith.constant 1.000000e+00 : f32
      %22 = vector.broadcast %cst_17 : f32 to vector<16x32xf32>
      %23 = arith.addf %22, %21 : vector<16x32xf32>
      %24 = arith.mulf %18, %23 : vector<16x32xf32>
      %cst_18 = arith.constant dense<0.000000e+00> : vector<16xf32>
      %25 = vector.multi_reduction <add>, %24, %cst_18 [1] : vector<16x32xf32> to vector<16xf32>
      %26 = vector.shape_cast %25 : vector<16xf32> to vector<16x1xf32>
      %cst_19 = arith.constant 3.200000e+01 : f32
      %27 = vector.broadcast %cst_19 : f32 to vector<16x1xf32>
      %28 = arith.divf %26, %27 : vector<16x1xf32>
      %29 = vector.broadcast %28 : vector<16x1xf32> to vector<16x32xf32>
      %30 = arith.subf %24, %29 : vector<16x32xf32>
      %31 = arith.mulf %30, %30 : vector<16x32xf32>
      %cst_20 = arith.constant dense<0.000000e+00> : vector<16xf32>
      %32 = vector.multi_reduction <add>, %31, %cst_20 [1] : vector<16x32xf32> to vector<16xf32>
      %33 = vector.shape_cast %32 : vector<16xf32> to vector<16x1xf32>
      %cst_21 = arith.constant 3.200000e+01 : f32
      %34 = vector.broadcast %cst_21 : f32 to vector<16x1xf32>
      %35 = arith.divf %33, %34 : vector<16x1xf32>
      %cst_22 = arith.constant 9.99999996E-13 : f32
      %36 = vector.broadcast %cst_22 : f32 to vector<16x1xf32>
      %37 = arith.addf %35, %36 : vector<16x1xf32>
      %38 = math.rsqrt %37 : vector<16x1xf32>
      %39 = vector.broadcast %38 : vector<16x1xf32> to vector<16x32xf32>
      %40 = arith.mulf %30, %39 : vector<16x32xf32>
      %41 = vector.extract_strided_slice %13 {offsets = [1, 0], sizes = [1, 32], strides = [1, 1]} : vector<3x32xf32> to vector<1x32xf32>
      %42 = vector.broadcast %41 : vector<1x32xf32> to vector<16x32xf32>
      %43 = arith.mulf %40, %42 : vector<16x32xf32>
      %44 = vector.extract_strided_slice %13 {offsets = [2, 0], sizes = [1, 32], strides = [1, 1]} : vector<3x32xf32> to vector<1x32xf32>
      %45 = vector.broadcast %44 : vector<1x32xf32> to vector<16x32xf32>
      %46 = arith.addf %43, %45 : vector<16x32xf32>
      %c0_23 = arith.constant 0 : index
      %c0_24 = arith.constant 0 : index
      %47 = vector.load %arg8[%c0_23, %c0_24] : memref<16x32xf32, #tpu.memory_space<vmem>>, vector<16x32xf32>
      tpu.vector_store %arg8[%c0_23, %c0_24], %46 {strides = array<i32>} : memref<16x32xf32, #tpu.memory_space<vmem>>, vector<16x32xf32>,
    } else {
    }
    %c0 = arith.constant 0 : index
    %c0_1 = arith.constant 0 : index
    %3 = vector.load %arg8[%c0, %c0_1] : memref<16x32xf32, #tpu.memory_space<vmem>>, vector<16x32xf32>
    %c0_2 = arith.constant 0 : index
    %c0_3 = arith.constant 0 : index
    %4 = vector.load %arg5[%c0_2, %c0_3] : memref<32x128xf32, #tpu.memory_space<vmem>>, vector<32x128xf32>
    %cst = arith.constant dense<0.000000e+00> : vector<16x128xf32>
    %5 = tpu.matmul %3, %4, %cst {dimension_numbers = #tpu.dot_dimension_numbers<[1], [0], [0], [1], [0, 0, 1, 1], [], []>} : vector<16x32xf32>, vector<32x128xf32>, vector<16x128xf32> -> vector<16x128xf32>
    %c0_4 = arith.constant 0 : index
    %c0_5 = arith.constant 0 : index
    %6 = vector.load %arg6[%c0_4, %c0_5] : memref<1x128xf32, #tpu.memory_space<vmem>>, vector<1x128xf32>
    %7 = vector.broadcast %6 : vector<1x128xf32> to vector<16x128xf32>
    %8 = arith.addf %5, %7 : vector<16x128xf32>
    %c0_6 = arith.constant 0 : index
    %c0_7 = arith.constant 0 : index
    %9 = vector.load %arg7[%c0_6, %c0_7] : memref<16x128xf32, #tpu.memory_space<vmem>>, vector<16x128xf32>
    tpu.vector_store %arg7[%c0_6, %c0_7], %8 {strides = array<i32>} : memref<16x128xf32, #tpu.memory_space<vmem>>, vector<16x128xf32>,
    return
  }
  func.func @transform_0(%arg0: i32, %arg1: i32) -> (i32, i32) {
    %c0_i32 = arith.constant 0 : i32
    %c0_i32_0 = arith.constant 0 : i32
    return %arg0, %c0_i32 : i32, i32
  }
  func.func @transform_1(%arg0: i32, %arg1: i32) -> (i32, i32) {
    %c0_i32 = arith.constant 0 : i32
    %c0_i32_0 = arith.constant 0 : i32
    %c0_i32_1 = arith.constant 0 : i32
    return %c0_i32, %c0_i32_0 : i32, i32
  }
  func.func @transform_2(%arg0: i32, %arg1: i32) -> (i32, i32) {
    %c0_i32 = arith.constant 0 : i32
    %c0_i32_0 = arith.constant 0 : i32
    %c0_i32_1 = arith.constant 0 : i32
    return %c0_i32, %c0_i32_0 : i32, i32
  }
  func.func @transform_3(%arg0: i32, %arg1: i32) -> (i32, i32) {
    %c0_i32 = arith.constant 0 : i32
    %c0_i32_0 = arith.constant 0 : i32
    return %c0_i32, %arg1 : i32, i32
  }
  func.func @transform_4(%arg0: i32, %arg1: i32) -> (i32, i32) {
    %c0_i32 = arith.constant 0 : i32
    %c0_i32_0 = arith.constant 0 : i32
    return %c0_i32, %arg1 : i32, i32
  }
  func.func @transform_5(%arg0: i32, %arg1: i32) -> (i32, i32) {
    %c0_i32 = arith.constant 0 : i32
    return %arg0, %arg1 : i32, i32
  }
}

</mosaic_0001>

<bundles_post_ra>
// kernel: tpu_custom_call.1
= control target key start
LH: loop header
LB: loop body
LE: loop exit
PB: predicated region body
PF: predicated region fallthrough
CT: control target
= control target key end

     0   :  { %10 = vsyncpa [#allocation4], 0  ;;  %s596_s0 = inlined_call_operand.hbm [shape: f32[16,32], index: 0, kind: input, shape index: {}]   ;;  %s597_s1 = inlined_call_operand.hbm [shape: f32[32,32], index: 1, kind: input, shape index: {}]   ;;  %s598_s2 = inlined_call_operand.hbm [shape: f32[3,32], index: 2, kind: input, shape index: {}]   ;;  %s599_s3 = inlined_call_operand.hbm [shape: f32[32,128], index: 3, kind: input, shape index: {}]   ;;  %s600_s4 = inlined_call_operand.vmem [shape: f32[1,128], index: 4, kind: input, shape index: {}]   ;;  %s601_s5 = inlined_call_operand.hbm [shape: f32[16,128], index: 5, kind: output, shape index: {}]  }
   0x1   :  { %11 = vsyncpa [#allocation7], 0 }
   0x2   :  { %12 = vsyncpa [#allocation10], 0 }
   0x3   :  { %13 = vsyncpa [#allocation5], 0  ;;  %s31_s20 = sshll.u32 %s597_s1, 4  ;;  %s495_s21 = smov [#allocation6]   ;;  %s32_s20 = int_to_ptr.hbm [resolvable:$true] %s31_s20 }
   0x4   :  { %s33_s22 = sshll.u32 %s495_s21, 4  ;;  %s18_s25 = sshll.u32 %s596_s0, 4  ;;  %s34_s22 = int_to_ptr.vmem [resolvable:$true] %s33_s22  ;;  %s19_s25 = int_to_ptr.hbm [resolvable:$true] %s18_s25 }
   0x5   :  { %s496_s26 = smov 128   ;;  %s497_s27 = smov 8  }
   0x6   :  { %39 = dma.hbm_to_vmem [thread:$0]  %s32_s20, 512, %s34_s22, [#allocation7], %s496_s26, %s496_s26, %s497_s27  }
   0x7   :  { %s498_s28 = smov [#allocation3]   ;;  %s45_s1 = sshll.u32 %s598_s2, 4  ;;  %s46_s1 = int_to_ptr.hbm [resolvable:$true] %s45_s1 }
   0x8   :  { %s20_s29 = sshll.u32 %s498_s28, 4  ;;  %s55_s8 = sshll.u32 %s599_s3, 4  ;;  %s21_s29 = int_to_ptr.vmem [resolvable:$true] %s20_s29  ;;  %s56_s8 = int_to_ptr.hbm [resolvable:$true] %s55_s8 }
   0x9   :  { %26 = dma.hbm_to_vmem [thread:$0]  %s19_s25, 256, %s21_s29, [#allocation4], %s496_s26, %s496_s26, %s497_s27  }
   0xa   :  { %s499_s9 = smov [#allocation8]   ;;  %s500_s11 = smov [#allocation9]  }
   0xb   :  { %s47_s10 = sshll.u32 %s499_s9, 4  ;;  %s57_s12 = sshll.u32 %s500_s11, 4  ;;  %s48_s10 = int_to_ptr.vmem [resolvable:$true] %s47_s10  ;;  %s58_s12 = int_to_ptr.vmem [resolvable:$true] %s57_s12 }
   0xc   :  { %50 = dma.hbm_to_vmem [thread:$0]  %s46_s1, 64, %s48_s10, [#allocation7]  }
   0xd   :  { %63 = dma.hbm_to_vmem [thread:$0]  %s56_s8, 512, %s58_s12, [#allocation10], %s496_s26, %s496_s26, %s497_s27  }
   0xe   :  { %487 = dma.done.wait [#allocation4], 256  }
   0xf   :  { %488 = vsyncadd [#allocation4], 4294967040 }
  0x10   :  { %489 = dma.done.wait [#allocation7], 576  }
  0x11   :  { %490 = vsyncadd [#allocation7], 4294966720 }
  0x12   :  { %491 = dma.done.wait [#allocation10], 512  }
  0x13   :  { %492 = vsyncadd [#allocation10], 4294966784  ;;  %v91_v0 = vld [vmem:[#allocation6 + $0x18] sm:$0xff]  ;;  %v90_v1 = vld [vmem:[#allocation6 + $0x10] sm:$0xff]  ;;  %vm94_vm0 = vcmask 261120   ;;  %s502_s13 = smov [#allocation11]  }
  0x14   :  { %113 = vmatpush.msra.mxu0 %v91_v0  ;;  %340 = vmatpush.msra.mxu2 %v91_v0  ;;  %v89_v2 = vld [vmem:[#allocation6 + $0x8] sm:$0xff]  ;;  %v88_v3 = vld [vmem:[#allocation6] sm:$0xff]  ;;  %v86_v4 = vld [vmem:[#allocation3] sm:$0xff]  ;;  %s317_s14 = sshll.u32 %s502_s13, 4  ;;  %s319_s17 = sshll.u32 %s601_s5, 4  ;;  %s318_s14 = int_to_ptr.vmem [resolvable:$true] %s317_s14  ;;  %s320_s17 = int_to_ptr.hbm [resolvable:$true] %s319_s17 }
  0x15   :  { %v87_v5 = vld [vmem:[#allocation3 + $0x8] sm:$0xff]  ;;  %v556_v6 = vld [vmem:[#allocation8] sm:$0x7] }
  0x16   :  { %114 = vmatpush.msra.mxu0 %v90_v1  ;;  %341 = vmatpush.msra.mxu2 %v90_v1  ;;  %v93_v7 = vperm.slane %v556_v6, 0 }
  0x18   :  { %115 = vmatpush.msra.mxu0 %v89_v2  ;;  %342 = vmatpush.msra.mxu2 %v89_v2 }
  0x1a   :  { %116 = vmatpush.msra.mxu0 %v88_v3  ;;  %343 = vmatpush.msra.mxu2 %v88_v3 }
  0x1b   :  { %334 = vmatmul.msk.f32.vlgmr.msra.gmra.mxu0 %vm94_vm0, %v86_v4  ;;  %335 = vmatmul.msk.f32.vlgmr.msra.gmra.mxu2 %vm94_vm0, %v87_v5 }
  0x98   :  { %v118_v8 = vpop.f32.mrf.mxu0 }
  0x99   :  { %v559_v9 = vadd.f32 %v118_v8, %v93_v7 }
  0x9b   :  { %v562_v10 = vmul.f32 0.70710677, %v559_v9 }
  0x9d   :  { %v128_v11 = vmul.f32 %v562_v10, %v562_v10 }
  0x9e   :  { %v121_v12 = vpop.f32.mrf.mxu2 }
  0x9f   :  { %v129_v13 = vmin.f32 %v128_v11, 16.0  ;;  %v566_v14 = vadd.f32 %v121_v12, %v93_v7 }
  0xa1   :  { %v130_v15 = vmul.f32 2.1237322e-06, %v129_v13  ;;  %v569_v16 = vmul.f32 0.70710677, %v566_v14  ;;  %v141_v17 = vmul.f32 3.8918573e-05, %v129_v13 }
  0xa3   :  { %v168_v18 = vmul.f32 %v569_v16, %v569_v16  ;;  %v142_v19 = vadd.f32 0.001143296, %v141_v17  ;;  %v131_v20 = vadd.f32 0.00028619796, %v130_v15 }
  0xa5   :  { %v169_v21 = vmin.f32 %v168_v18, 16.0  ;;  %v143_v22 = vmul.f32 %v142_v19, %v129_v13  ;;  %v132_v26 = vmul.f32 %v131_v20, %v129_v13 }
  0xa7   :  { %v170_v23 = vmul.f32 2.1237322e-06, %v169_v21  ;;  %v181_v24 = vmul.f32 3.8918573e-05, %v169_v21  ;;  %v144_v25 = vadd.f32 0.014752088, %v143_v22 }
  0xa8   :  { %v133_v33 = vadd.f32 0.0036580483, %v132_v26 }
  0xa9   :  { %v171_v27 = vadd.f32 0.00028619796, %v170_v23  ;;  %v182_v28 = vadd.f32 0.001143296, %v181_v24  ;;  %v145_v29 = vmul.f32 %v144_v25, %v129_v13  ;;  %v125_v24 = vmul.f32 0.5, %v566_v14 }
  0xaa   :  { %v134_v39 = vmul.f32 %v133_v33, %v129_v13 }
  0xab   :  { %v172_v30 = vmul.f32 %v171_v27, %v169_v21  ;;  %v183_v31 = vmul.f32 %v182_v28, %v169_v21  ;;  %v146_v32 = vadd.f32 0.112945676, %v145_v29 }
  0xac   :  { %v135_v45 = vadd.f32 0.05243302, %v134_v39 }
  0xad   :  { %v173_v34 = vadd.f32 0.0036580483, %v172_v30  ;;  %v184_v35 = vadd.f32 0.014752088, %v183_v31  ;;  %v147_v36 = vmul.f32 %v146_v32, %v129_v13  ;;  %v124_v30 = vmul.f32 0.5, %v559_v9 }
  0xae   :  { %v136_v49 = vmul.f32 %v135_v45, %v129_v13  ;;  %v501_v31 = vmov 32.0  }
  0xaf   :  { %v185_v37 = vmul.f32 %v184_v35, %v169_v21  ;;  %v148_v38 = vadd.f32 0.4994258, %v147_v36  ;;  %v174_v40 = vmul.f32 %v173_v34, %v169_v21 }
  0xb0   :  { %v137_v53 = vadd.f32 0.18741608, %v136_v49 }
  0xb1   :  { %v186_v41 = vadd.f32 0.112945676, %v185_v37  ;;  %v149_v42 = vmul.f32 %v148_v38, %v129_v13  ;;  %v175_v46 = vadd.f32 0.05243302, %v174_v40 }
  0xb2   :  { %v138_v58 = vmul.f32 %v137_v53, %v129_v13 }
  0xb3   :  { %v187_v43 = vmul.f32 %v186_v41, %v169_v21  ;;  %v150_v44 = vadd.f32 1.0, %v149_v42  ;;  %v176_v50 = vmul.f32 %v175_v46, %v169_v21  ;;  %v276_v46 = vld [vmem:[#allocation9 + $0x18] sm:$0xff] }
  0xb4   :  { %v139_v2 = vadd.f32 1.1283791, %v138_v58  ;;  %344 = vmatpush.msra.mxu3 %v276_v46  ;;  %300 = vmatpush.msra.mxu1 %v276_v46 }
  0xb5   :  { %v188_v47 = vadd.f32 0.4994258, %v187_v43  ;;  %357 = vrcp.f32 %v150_v44  ;;  %v177_v54 = vadd.f32 0.18741608, %v176_v50  ;;  %v162_v63 = vand.u32 2147483648, %v150_v44  ;;  %v274_v50 = vld [vmem:[#allocation9 + $0x8] sm:$0xff] }
  0xb6   :  { %vm156_vm2 = vweird.f32 %v150_v44  ;;  %v160_v1 = vand.u32 2147483647, %v150_v44  ;;  %v140_v17 = vmul.f32 %v139_v2, %v562_v10 }
  0xb7   :  { %v189_v48 = vmul.f32 %v188_v47, %v169_v21  ;;  %v178_v59 = vmul.f32 %v177_v54, %v169_v21  ;;  %v163_v11 = vor.u32 1.1754944e-38, %v162_v63 }
  0xb8   :  { %vm161_vm6 = vcmp.eq.f32.partialorder %v160_v1, 8.507059e+37 }
  0xb9   :  { %v190_v51 = vadd.f32 1.0, %v189_v48  ;;  %v179_v3 = vadd.f32 1.1283791, %v178_v59  ;;  %v275_v48 = vld [vmem:[#allocation9 + $0x10] sm:$0xff] }
  0xba   :  { %345 = vmatpush.msra.mxu3 %v275_v48  ;;  %301 = vmatpush.msra.mxu1 %v275_v48 }
  0xbb   :  { %359 = vrcp.f32 %v190_v51  ;;  %v358_v52 = vpop.eup %357  ;;  %v202_v4 = vand.u32 2147483648, %v190_v51  ;;  %v200_v7 = vand.u32 2147483647, %v190_v51  ;;  %vm196_vm5 = vweird.f32 %v190_v51 }
  0xbc   :  { %v152_v55 = vmul.f32 %v358_v52, %v150_v44  ;;  %vm157_vm1 = vweird.f32 %v358_v52  ;;  %v180_v18 = vmul.f32 %v179_v3, %v569_v16  ;;  %361 = vrcp.f32 %v501_v31  ;;  %346 = vmatpush.msra.mxu3 %v274_v50  ;;  %302 = vmatpush.msra.mxu1 %v274_v50 }
  0xbd   :  { %vm158_vm3 = vmor %vm156_vm2, %vm157_vm1  ;;  %v203_v13 = vor.u32 1.1754944e-38, %v202_v4  ;;  %vm201_vm8 = vcmp.eq.f32.partialorder %v200_v7, 8.507059e+37  ;;  %v266_v3 = vperm.slane %v556_v6, 2 }
  0xbe   :  { %v153_v56 = vsub.f32 1.0, %v152_v55 }
  0xc0   :  { %v154_v60 = vmul.f32 %v358_v52, %v153_v56 }
  0xc1   :  { %v360_v57 = vpop.eup %359 }
  0xc2   :  { %v192_v61 = vmul.f32 %v360_v57, %v190_v51  ;;  %v155_v62 = vadd.f32 %v358_v52, %v154_v60  ;;  %vm197_vm4 = vweird.f32 %v360_v57  ;;  %v362_v32 = vpop.eup %361 }
  0xc3   :  { %vm198_vm7 = vmor %vm196_vm5, %vm197_vm4  ;;  %v219_v33 = vmul.f32 32.0, %v362_v32  ;;  %vm223_vm9 = vweird.f32 %v362_v32 }
  0xc4   :  { %v193_v0 = vsub.f32 1.0, %v192_v61  ;;  %v159_v8 = vsel %vm158_vm3, %v358_v52, %v155_v62  ;;  %v273_v52 = vld [vmem:[#allocation9] sm:$0xff] }
  0xc5   :  { %v164_v15 = vsel %vm161_vm6, %v163_v11, %v159_v8  ;;  %v220_v34 = vsub.f32 1.0, %v219_v33  ;;  %347 = vmatpush.msra.mxu3 %v273_v52  ;;  %303 = vmatpush.msra.mxu1 %v273_v52 }
  0xc6   :  { %v194_v5 = vmul.f32 %v360_v57, %v193_v0  ;;  %v165_v22 = vmul.f32 %v164_v15, %v140_v17  ;;  %v263_v0 = vperm.slane %v556_v6, 1 }
  0xc7   :  { %v221_v35 = vmul.f32 %v362_v32, %v220_v34 }
  0xc8   :  { %v195_v12 = vadd.f32 %v360_v57, %v194_v5  ;;  %v336_v26 = vclamps-f32 %v165_v22, 1.0 }
  0xc9   :  { %v222_v14 = vadd.f32 %v362_v32, %v221_v35 }
  0xca   :  { %v199_v19 = vsel %vm198_vm7, %v360_v57, %v195_v12  ;;  %v208_v29 = vadd.f32 1.0, %v336_v26 }
  0xcb   :  { %v204_v20 = vsel %vm201_vm8, %v203_v13, %v199_v19  ;;  %v224_v36 = vsel %vm223_vm9, %v362_v32, %v222_v14 }
  0xcc   :  { %v205_v21 = vmul.f32 %v204_v20, %v180_v18  ;;  %v210_v10 = vmul.f32 %v208_v29, %v124_v30  ;;  %v356_v20 = vld [vmem:[%s600_s4] ss:$0 sm:$0xff] }
  0xce   :  { %v337_v23 = vclamps-f32 %v205_v21, 1.0  ;;  %v212_v16 = vsel %vm94_vm0, %v210_v10, 0.0 }
  0xd0   :  { %v209_v25 = vadd.f32 1.0, %v337_v23 }
  0xd2   :  { %v211_v27 = vmul.f32 %v209_v25, %v125_v24 }
  0xd4   :  { %v215_v28 = vsel %vm94_vm0, %v211_v27, 0.0 }
  0xd5   :  { %216 = vadd.xlane.f32.xlu0 %v215_v28 }
  0xdd   :  { %213 = vadd.xlane.f32.xlu0 %v212_v16 }
 0x148   :  { %v217_v37 = vpop.xlane.xlu0 %216 }
 0x149   :  { %v226_v38 = vmul.f32 %v224_v36, %v217_v37 }
 0x14b   :  { %v228_v39 = vsub.f32 %v211_v27, %v226_v38 }
 0x14d   :  { %v230_v40 = vmul.f32 %v228_v39, %v228_v39 }
 0x14f   :  { %v234_v41 = vsel %vm94_vm0, %v230_v40, 0.0 }
 0x150   :  { %235 = vadd.xlane.f32.xlu1 %v234_v41  ;;  %v214_v9 = vpop.xlane.xlu0 %213 }
 0x151   :  { %v225_v42 = vmul.f32 %v224_v36, %v214_v9 }
 0x153   :  { %v227_v43 = vsub.f32 %v210_v10, %v225_v42 }
 0x155   :  { %v229_v44 = vmul.f32 %v227_v43, %v227_v43 }
 0x157   :  { %v231_v45 = vsel %vm94_vm0, %v229_v44, 0.0 }
 0x158   :  { %232 = vadd.xlane.f32.xlu1 %v231_v45 }
 0x1c3   :  { %v236_v47 = vpop.xlane.xlu1 %235 }
 0x1c4   :  { %v238_v49 = vmul.f32 %v236_v47, %v224_v36 }
 0x1c6   :  { %v240_v51 = vadd.f32 1e-12, %v238_v49 }
 0x1c8   :  { %363 = vrsqrt.f32 %v240_v51  ;;  %vm257_vm11 = vweird.f32 %v240_v51 }
 0x1cb   :  { %v233_v53 = vpop.xlane.xlu1 %232 }
 0x1cc   :  { %v237_v54 = vmul.f32 %v233_v53, %v224_v36 }
 0x1ce   :  { %v364_v55 = vpop.eup %363  ;;  %v239_v56 = vadd.f32 1e-12, %v237_v54 }
 0x1cf   :  { %v252_v57 = vmul.f32 %v364_v55, %v240_v51  ;;  %vm258_vm10 = vweird.f32 %v364_v55 }
 0x1d0   :  { %365 = vrsqrt.f32 %v239_v56  ;;  %vm259_vm12 = vmor %vm257_vm11, %vm258_vm10  ;;  %vm247_vm14 = vweird.f32 %v239_v56 }
 0x1d1   :  { %v253_v58 = vmul.f32 %v364_v55, %v252_v57 }
 0x1d3   :  { %v254_v59 = vmul.f32 0.5, %v253_v58 }
 0x1d5   :  { %v255_v60 = vsub.f32 1.5, %v254_v59 }
 0x1d6   :  { %v366_v61 = vpop.eup %365 }
 0x1d7   :  { %v256_v62 = vmul.f32 %v364_v55, %v255_v60  ;;  %v242_v63 = vmul.f32 %v366_v61, %v239_v56  ;;  %vm248_vm13 = vweird.f32 %v366_v61 }
 0x1d8   :  { %vm249_vm15 = vmor %vm247_vm14, %vm248_vm13 }
 0x1d9   :  { %v260_v1 = vsel %vm259_vm12, %v364_v55, %v256_v62  ;;  %v243_v2 = vmul.f32 %v366_v61, %v242_v63 }
 0x1da   :  { %v262_v4 = vmul.f32 %v260_v1, %v228_v39 }
 0x1db   :  { %v244_v5 = vmul.f32 0.5, %v243_v2 }
 0x1dc   :  { %v265_v7 = vmul.f32 %v263_v0, %v262_v4 }
 0x1dd   :  { %v245_v8 = vsub.f32 1.5, %v244_v5 }
 0x1de   :  { %v268_v11 = vadd.f32 %v266_v3, %v265_v7 }
 0x1df   :  { %v246_v12 = vmul.f32 %v366_v61, %v245_v8 }
 0x1e0   :  { %270 = vst.msk [vmem:[#allocation2 + $0x8] sm:$0xff] %vm94_vm0, %v268_v11 }
 0x1e1   :  { %v250_v13 = vsel %vm249_vm15, %v366_v61, %v246_v12 }
 0x1e2   :  { %v261_v15 = vmul.f32 %v250_v13, %v227_v43 }
 0x1e4   :  { %v264_v17 = vmul.f32 %v263_v0, %v261_v15 }
 0x1e6   :  { %v267_v18 = vadd.f32 %v266_v3, %v264_v17 }
 0x1e7   :  { %v272_v19 = vld [vmem:[#allocation2 + $0x8] sm:$0xff] }
 0x1e8   :  { %269 = vst.msk [vmem:[#allocation2] sm:$0xff] %vm94_vm0, %v267_v18  ;;  %339 = vmatmul.msk.f32.vlgmr.msra.gmra.mxu3 %vm94_vm0, %v272_v19 }
 0x1ef   :  { %v271_v6 = vld [vmem:[#allocation2] sm:$0xff] }
 0x1f0   :  { %338 = vmatmul.msk.f32.vlgmr.msra.gmra.mxu1 %vm94_vm0, %v271_v6 }
 0x26b   :  { %v308_v21 = vpop.f32.mrf.mxu3 }
 0x26c   :  { %v309_v22 = vadd.f32 %v356_v20, %v308_v21 }
 0x26d   :  { %v305_v23 = vpop.f32.mrf.mxu1 }
 0x26e   :  { %312 = vst [vmem:[#allocation11 + $0x8] sm:$0xff] %v309_v22  ;;  %v306_v24 = vadd.f32 %v356_v20, %v305_v23 }
 0x270   :  { %311 = vst [vmem:[#allocation11] sm:$0xff] %v306_v24 }
 0x271   :  { %325 = dma.vmem_to_hbm [thread:$0]  %s318_s14, 256, %s320_s17, [#allocation5], %s496_s26, %s496_s26, %s497_s27  }
 0x272   :  { %493 = dma.done.wait [#allocation5], 256  }
 0x273   :  { %494 = vsyncadd [#allocation5], 4294967040 }
 0x274   :  { %330 = vsyncpa [#allocation4], 1 }
 0x275   :  { %331 = vsyncpa [#allocation7], 1 }
 0x276   :  { %332 = vsyncpa [#allocation10], 1 }
 0x277   :  { %333 = vsyncpa [#allocation5], 1 }

</bundles_post_ra>
